<compile_context>
chip_gen: v6e
topology: v6e:2x2x1
jax: 0.10.0
libtpu: 0.0.40
codegen_flags: <defaults>
</compile_context>

<pallas_src>
import functools

import jax
import jax.numpy as jnp
from jax.experimental import pallas as pl
from jax.experimental.pallas import tpu as pltpu


def _round_up(n, m):
    return (n + m - 1) // m * m


def _sigmoid_f32(z):
    # sigmoid(z) == 0.5 * (tanh(z/2) + 1): single EUP transcendental, no
    # divide on the VALU slot (v5e-friendly; neutral on v6e/v7x).
    return 0.5 * jnp.tanh(0.5 * z) + 0.5


def _pick_batch_tile(batch, block_b):
    """Pick (TB, Bp, steps) for the batch grid.

    TB is a multiple of 8 (sublanes), capped by block_b; there are >=2 grid
    steps whenever the batch spans >=2 sublane groups (feeds both v7x
    TensorCores); the 8-rounded batch is split as evenly as possible so
    padding waste stays < 8*steps rows; TB is only rounded up to a multiple
    of 256 (full MXU M-dim on v6e/v7x) when that adds negligible padding.
    """
    SUB, GRAN = 8, 256
    b8 = _round_up(batch, SUB)
    steps = max(pl.cdiv(b8, block_b), 2 if b8 >= 2 * SUB else 1)
    tb = _round_up(pl.cdiv(b8, steps), SUB)
    if tb > GRAN and steps * _round_up(tb, GRAN) - b8 <= max(64, b8 // 16):
        tb = _round_up(tb, GRAN)
    steps = pl.cdiv(b8, tb)
    return tb, steps * tb, steps


def _mlp_kernel(x_ref, w1_ref, b1_ref, w2_ref, b2_ref, w3_ref, b3_ref,
                fc_out_ref, fc_in_ref):
    # x arrives as f32 (no wrapper-side cast copy); cast to bf16 in-kernel for
    # the MXU.  All matmuls accumulate in f32; bias add + sigmoid run in f32
    # on the VPU/EUP (v5e has no bf16 VPU/EUP).
    x = x_ref[...].astype(jnp.bfloat16)                               # (TB, Dp)
    h1 = jnp.dot(x, w1_ref[...], preferred_element_type=jnp.float32)  # (TB, Hp)
    h1 = _sigmoid_f32(h1 + b1_ref[...])
    h2 = jnp.dot(h1.astype(jnp.bfloat16), w2_ref[...],
                 preferred_element_type=jnp.float32)                  # (TB, Hp)
    h2 = _sigmoid_f32(h2 + b2_ref[...])
    fc_in_ref[...] = h2.astype(fc_in_ref.dtype)
    out = jnp.dot(h2.astype(jnp.bfloat16), w3_ref[...],
                  preferred_element_type=jnp.float32)                 # (TB, Cp)
    fc_out_ref[...] = (out + b3_ref[...]).astype(fc_out_ref.dtype)


def pad_params(w1, b1, w2, b2, w3, b3):
    """Pad features to multiples of 128 and cast weights to bf16.

    Call ONCE per parameter set (outside the training/inference loop).  Zero
    padding keeps the math exact: padded hidden activations become
    sigmoid(0)=0.5, but the corresponding zero rows of W2/W3 cancel them, and
    padded fc_in/fc_out columns are sliced off in the wrapper.
    """
    D, H = w1.shape
    C = w3.shape[1]
    Dp, Hp, Cp = (_round_up(v, 128) for v in (D, H, C))
    f32, bf16 = jnp.float32, jnp.bfloat16
    w1_p = jnp.pad(w1, ((0, Dp - D), (0, Hp - H))).astype(bf16)
    b1_p = jnp.pad(b1.reshape(1, -1), ((0, 0), (0, Hp - H))).astype(f32)
    w2_p = jnp.pad(w2, ((0, Hp - H), (0, Hp - H))).astype(bf16)
    b2_p = jnp.pad(b2.reshape(1, -1), ((0, 0), (0, Hp - H))).astype(f32)
    w3_p = jnp.pad(w3, ((0, Hp - H), (0, Cp - C))).astype(bf16)
    b3_p = jnp.pad(b3.reshape(1, -1), ((0, 0), (0, Cp - C))).astype(f32)
    return (w1_p, b1_p, w2_p, b2_p, w3_p, b3_p)


@functools.partial(jax.jit, static_argnames=("hidden", "num_classes", "block_b"))
def mlp_forward(x, params, *, hidden, num_classes, block_b=1024):
    """x: (B, C, H, W) f32.  params: output of pad_params (padded bf16 weights,
    f32 biases).  Returns (fc_out (B, num_classes), fc_in (B, hidden))."""
    w1_p, b1_p, w2_p, b2_p, w3_p, b3_p = params
    B = x.shape[0]
    x_flat = x.reshape(B, -1)            # NCHW flatten, matches nn.Flatten
    D = x_flat.shape[1]
    Dp, Hp = w1_p.shape
    Cp = w3_p.shape[1]
    f32 = jnp.float32

    TB, Bp, steps = _pick_batch_tile(B, block_b)
    # Pad in f32 (no dtype-cast copy of the activations); skipped entirely
    # when B and D are already tile/lane aligned.
    if (Bp, Dp) != (B, D):
        x_flat = jnp.pad(x_flat, ((0, Bp - B), (0, Dp - D)))

    grid = (steps,)
    row_spec = lambda shp: pl.BlockSpec(shp, lambda i: (0, 0))   # VMEM-resident
    bat_spec = lambda shp: pl.BlockSpec(shp, lambda i: (i, 0))   # batch-tiled

    cost = pl.CostEstimate(
        flops=2 * Bp * (Dp * Hp + Hp * Hp + Hp * Cp),
        transcendentals=2 * Bp * Hp,                     # sigmoids (tanh on EUP)
        bytes_accessed=(Bp * Dp * 4                       # x (f32)
                        + (w1_p.size + w2_p.size + w3_p.size) * 2
                        + (b1_p.size + b2_p.size + b3_p.size) * 4
                        + Bp * Cp * 4 + Bp * Hp * 4),     # outputs (f32)
    )

    fc_out_p, fc_in_p = pl.pallas_call(
        _mlp_kernel,
        grid=grid,
        out_shape=(
            jax.ShapeDtypeStruct((Bp, Cp), f32),   # fc_out (padded)
            jax.ShapeDtypeStruct((Bp, Hp), f32),   # fc_in  (padded)
        ),
        in_specs=[
            bat_spec((TB, Dp)),
            row_spec((Dp, Hp)), row_spec((1, Hp)),
            row_spec((Hp, Hp)), row_spec((1, Hp)),
            row_spec((Hp, Cp)), row_spec((1, Cp)),
        ],
        out_specs=(
            bat_spec((TB, Cp)),
            bat_spec((TB, Hp)),
        ),
        compiler_params=pltpu.CompilerParams(
            dimension_semantics=("parallel",),
            vmem_limit_bytes=32 * 1024 * 1024),
        cost_estimate=cost,
    )(x_flat, w1_p, b1_p, w2_p, b2_p, w3_p, b3_p)

    # Slice the zero-padding back off.
    return fc_out_p[:B, :num_classes], fc_in_p[:B, :hidden]


def _init_linear(key, fan_in, fan_out):
    """Deterministic init mimicking nn.Linear default: U(-1/sqrt(fan_in), +)."""
    kw, kb = jax.random.split(key)
    bound = 1.0 / jnp.sqrt(float(fan_in))
    w = jax.random.uniform(kw, (fan_in, fan_out), jnp.float32, -bound, bound)
    b = jax.random.uniform(kb, (1, fan_out), jnp.float32, -bound, bound)
    return w, b


if __name__ == "__main__":
    # Small shapes consistent with the module's forward:
    #   batch=2, channel=4, img_shape=(16,16), hidden=32, num_classes=10
    B, CH, IH, IW = 2, 4, 16, 16
    HIDDEN, NUM_CLASSES = 32, 10
    D = CH * IH * IW

    key = jax.random.PRNGKey(0)
    kx, k1, k2, k3 = jax.random.split(key, 4)

    x = jax.random.normal(kx, (B, CH, IH, IW), jnp.float32)
    w1, b1 = _init_linear(k1, D, HIDDEN)
    w2, b2 = _init_linear(k2, HIDDEN, HIDDEN)
    w3, b3 = _init_linear(k3, HIDDEN, NUM_CLASSES)

    params = pad_params(w1, b1, w2, b2, w3, b3)   # one-time pad + bf16 cast
    fc_out, fc_in = mlp_forward(x, params, hidden=HIDDEN, num_classes=NUM_CLASSES)
    jax.block_until_ready((fc_out, fc_in))

    # Sanity check against a pure-JAX f32 reference (loose tolerance because
    # the kernel uses bf16 matmul operands with f32 accumulation).
    xf = x.reshape(B, -1)
    h1 = jax.nn.sigmoid(xf @ w1 + b1)
    h2 = jax.nn.sigmoid(h1 @ w2 + b2)
    ref_out = h2 @ w3 + b3
    assert fc_out.shape == (B, NUM_CLASSES) and fc_in.shape == (B, HIDDEN)
    assert jnp.allclose(fc_in, h2, atol=2e-2, rtol=2e-2), "fc_in mismatch"
    assert jnp.allclose(fc_out, ref_out, atol=2e-2, rtol=2e-2), "fc_out mismatch"

    print("KERNEL_OK")
</pallas_src>

<mosaic_0001>
module attributes {stable_mosaic.version = 11 : i64} {
  func.func @_mlp_kernel(%arg0: i32, %arg1: memref<8x1024xf32, #tpu.memory_space<vmem>>, %arg2: memref<1024x128xbf16, #tpu.memory_space<vmem>>, %arg3: memref<1x128xf32, #tpu.memory_space<vmem>>, %arg4: memref<128x128xbf16, #tpu.memory_space<vmem>>, %arg5: memref<1x128xf32, #tpu.memory_space<vmem>>, %arg6: memref<128x128xbf16, #tpu.memory_space<vmem>>, %arg7: memref<1x128xf32, #tpu.memory_space<vmem>>, %arg8: memref<8x128xf32, #tpu.memory_space<vmem>>, %arg9: memref<8x128xf32, #tpu.memory_space<vmem>>) attributes {dimension_semantics = [#tpu.dimension_semantics<parallel>], iteration_bounds = array<i64: 1>, scalar_prefetch = 0 : i64, scratch_operands = 0 : i64, tpu.core_type = #tpu.core_type<tc>, window_params = [{transform_indices = @transform_0, window_bounds = array<i64: 8, 1024>}, {pipeline_mode = #tpu.pipeline_mode<synchronous>, transform_indices = @transform_1, window_bounds = array<i64: 1024, 128>}, {pipeline_mode = #tpu.pipeline_mode<synchronous>, transform_indices = @transform_2, window_bounds = array<i64: 1, 128>}, {pipeline_mode = #tpu.pipeline_mode<synchronous>, transform_indices = @transform_3, window_bounds = array<i64: 128, 128>}, {pipeline_mode = #tpu.pipeline_mode<synchronous>, transform_indices = @transform_4, window_bounds = array<i64: 1, 128>}, {pipeline_mode = #tpu.pipeline_mode<synchronous>, transform_indices = @transform_5, window_bounds = array<i64: 128, 128>}, {pipeline_mode = #tpu.pipeline_mode<synchronous>, transform_indices = @transform_6, window_bounds = array<i64: 1, 128>}, {transform_indices = @transform_7, window_bounds = array<i64: 8, 128>}, {transform_indices = @transform_8, window_bounds = array<i64: 8, 128>}]} {
    %c0 = arith.constant 0 : index
    %c0_0 = arith.constant 0 : index
    %0 = vector.load %arg1[%c0, %c0_0] : memref<8x1024xf32, #tpu.memory_space<vmem>>, vector<8x1024xf32>
    %1 = arith.truncf %0 : vector<8x1024xf32> to vector<8x1024xbf16>
    %c0_1 = arith.constant 0 : index
    %c0_2 = arith.constant 0 : index
    %2 = vector.load %arg2[%c0_1, %c0_2] : memref<1024x128xbf16, #tpu.memory_space<vmem>>, vector<1024x128xbf16>
    %cst = arith.constant dense<0.000000e+00> : vector<8x128xf32>
    %3 = tpu.matmul %1, %2, %cst {dimension_numbers = #tpu.dot_dimension_numbers<[1], [0], [0], [1], [0, 0, 1, 1], [], []>} : vector<8x1024xbf16>, vector<1024x128xbf16>, vector<8x128xf32> -> vector<8x128xf32>
    %c0_3 = arith.constant 0 : index
    %c0_4 = arith.constant 0 : index
    %4 = vector.load %arg3[%c0_3, %c0_4] : memref<1x128xf32, #tpu.memory_space<vmem>>, vector<1x128xf32>
    %5 = vector.broadcast %4 : vector<1x128xf32> to vector<8x128xf32>
    %6 = arith.addf %3, %5 : vector<8x128xf32>
    %cst_5 = arith.constant 5.000000e-01 : f32
    %7 = vector.broadcast %cst_5 : f32 to vector<8x128xf32>
    %8 = arith.mulf %7, %6 : vector<8x128xf32>
    %9 = math.tanh %8 : vector<8x128xf32>
    %cst_6 = arith.constant 5.000000e-01 : f32
    %10 = vector.broadcast %cst_6 : f32 to vector<8x128xf32>
    %11 = arith.mulf %10, %9 : vector<8x128xf32>
    %cst_7 = arith.constant 5.000000e-01 : f32
    %12 = vector.broadcast %cst_7 : f32 to vector<8x128xf32>
    %13 = arith.addf %11, %12 : vector<8x128xf32>
    %14 = arith.truncf %13 : vector<8x128xf32> to vector<8x128xbf16>
    %c0_8 = arith.constant 0 : index
    %c0_9 = arith.constant 0 : index
    %15 = vector.load %arg4[%c0_8, %c0_9] : memref<128x128xbf16, #tpu.memory_space<vmem>>, vector<128x128xbf16>
    %cst_10 = arith.constant dense<0.000000e+00> : vector<8x128xf32>
    %16 = tpu.matmul %14, %15, %cst_10 {dimension_numbers = #tpu.dot_dimension_numbers<[1], [0], [0], [1], [0, 0, 1, 1], [], []>} : vector<8x128xbf16>, vector<128x128xbf16>, vector<8x128xf32> -> vector<8x128xf32>
    %c0_11 = arith.constant 0 : index
    %c0_12 = arith.constant 0 : index
    %17 = vector.load %arg5[%c0_11, %c0_12] : memref<1x128xf32, #tpu.memory_space<vmem>>, vector<1x128xf32>
    %18 = vector.broadcast %17 : vector<1x128xf32> to vector<8x128xf32>
    %19 = arith.addf %16, %18 : vector<8x128xf32>
    %cst_13 = arith.constant 5.000000e-01 : f32
    %20 = vector.broadcast %cst_13 : f32 to vector<8x128xf32>
    %21 = arith.mulf %20, %19 : vector<8x128xf32>
    %22 = math.tanh %21 : vector<8x128xf32>
    %cst_14 = arith.constant 5.000000e-01 : f32
    %23 = vector.broadcast %cst_14 : f32 to vector<8x128xf32>
    %24 = arith.mulf %23, %22 : vector<8x128xf32>
    %cst_15 = arith.constant 5.000000e-01 : f32
    %25 = vector.broadcast %cst_15 : f32 to vector<8x128xf32>
    %26 = arith.addf %24, %25 : vector<8x128xf32>
    %c0_16 = arith.constant 0 : index
    %c0_17 = arith.constant 0 : index
    %27 = vector.load %arg9[%c0_16, %c0_17] : memref<8x128xf32, #tpu.memory_space<vmem>>, vector<8x128xf32>
    tpu.vector_store %arg9[%c0_16, %c0_17], %26 {strides = array<i32>} : memref<8x128xf32, #tpu.memory_space<vmem>>, vector<8x128xf32>,
    %28 = arith.truncf %26 : vector<8x128xf32> to vector<8x128xbf16>
    %c0_18 = arith.constant 0 : index
    %c0_19 = arith.constant 0 : index
    %29 = vector.load %arg6[%c0_18, %c0_19] : memref<128x128xbf16, #tpu.memory_space<vmem>>, vector<128x128xbf16>
    %cst_20 = arith.constant dense<0.000000e+00> : vector<8x128xf32>
    %30 = tpu.matmul %28, %29, %cst_20 {dimension_numbers = #tpu.dot_dimension_numbers<[1], [0], [0], [1], [0, 0, 1, 1], [], []>} : vector<8x128xbf16>, vector<128x128xbf16>, vector<8x128xf32> -> vector<8x128xf32>
    %c0_21 = arith.constant 0 : index
    %c0_22 = arith.constant 0 : index
    %31 = vector.load %arg7[%c0_21, %c0_22] : memref<1x128xf32, #tpu.memory_space<vmem>>, vector<1x128xf32>
    %32 = vector.broadcast %31 : vector<1x128xf32> to vector<8x128xf32>
    %33 = arith.addf %30, %32 : vector<8x128xf32>
    %c0_23 = arith.constant 0 : index
    %c0_24 = arith.constant 0 : index
    %34 = vector.load %arg8[%c0_23, %c0_24] : memref<8x128xf32, #tpu.memory_space<vmem>>, vector<8x128xf32>
    tpu.vector_store %arg8[%c0_23, %c0_24], %33 {strides = array<i32>} : memref<8x128xf32, #tpu.memory_space<vmem>>, vector<8x128xf32>,
    return
  }
  func.func @transform_0(%arg0: i32) -> (i32, i32) {
    %c0_i32 = arith.constant 0 : i32
    %c0_i32_0 = arith.constant 0 : i32
    return %arg0, %c0_i32 : i32, i32
  }
  func.func @transform_1(%arg0: i32) -> (i32, i32) {
    %c0_i32 = arith.constant 0 : i32
    %c0_i32_0 = arith.constant 0 : i32
    %c0_i32_1 = arith.constant 0 : i32
    return %c0_i32, %c0_i32_0 : i32, i32
  }
  func.func @transform_2(%arg0: i32) -> (i32, i32) {
    %c0_i32 = arith.constant 0 : i32
    %c0_i32_0 = arith.constant 0 : i32
    %c0_i32_1 = arith.constant 0 : i32
    return %c0_i32, %c0_i32_0 : i32, i32
  }
  func.func @transform_3(%arg0: i32) -> (i32, i32) {
    %c0_i32 = arith.constant 0 : i32
    %c0_i32_0 = arith.constant 0 : i32
    %c0_i32_1 = arith.constant 0 : i32
    return %c0_i32, %c0_i32_0 : i32, i32
  }
  func.func @transform_4(%arg0: i32) -> (i32, i32) {
    %c0_i32 = arith.constant 0 : i32
    %c0_i32_0 = arith.constant 0 : i32
    %c0_i32_1 = arith.constant 0 : i32
    return %c0_i32, %c0_i32_0 : i32, i32
  }
  func.func @transform_5(%arg0: i32) -> (i32, i32) {
    %c0_i32 = arith.constant 0 : i32
    %c0_i32_0 = arith.constant 0 : i32
    %c0_i32_1 = arith.constant 0 : i32
    return %c0_i32, %c0_i32_0 : i32, i32
  }
  func.func @transform_6(%arg0: i32) -> (i32, i32) {
    %c0_i32 = arith.constant 0 : i32
    %c0_i32_0 = arith.constant 0 : i32
    %c0_i32_1 = arith.constant 0 : i32
    return %c0_i32, %c0_i32_0 : i32, i32
  }
  func.func @transform_7(%arg0: i32) -> (i32, i32) {
    %c0_i32 = arith.constant 0 : i32
    %c0_i32_0 = arith.constant 0 : i32
    return %arg0, %c0_i32 : i32, i32
  }
  func.func @transform_8(%arg0: i32) -> (i32, i32) {
    %c0_i32 = arith.constant 0 : i32
    %c0_i32_0 = arith.constant 0 : i32
    return %arg0, %c0_i32 : i32, i32
  }
}

</mosaic_0001>

<bundles_post_ra>
// kernel: mlp_forward.1
= control target key start
LH: loop header
LB: loop body
LE: loop exit
PB: predicated region body
PF: predicated region fallthrough
CT: control target
= control target key end

     0   :  { %14 = vsyncpa [#allocation3], 0  ;;  %s1321_s27 = smov [#allocation2]   ;;  %s1479_s0 = inlined_call_operand.vmem [shape: f32[8,1024], index: 0, kind: input, shape index: {}]   ;;  %s1480_s1 = inlined_call_operand.hbm [shape: bf16[1024,128], index: 1, kind: input, shape index: {}]   ;;  %s1481_s2 = inlined_call_operand.vmem [shape: f32[1,128], index: 2, kind: input, shape index: {}]   ;;  %s1482_s3 = inlined_call_operand.vmem [shape: bf16[128,128], index: 3, kind: input, shape index: {}]   ;;  %s1483_s4 = inlined_call_operand.vmem [shape: f32[1,128], index: 4, kind: input, shape index: {}]   ;;  %s1484_s5 = inlined_call_operand.vmem [shape: bf16[128,128], index: 5, kind: input, shape index: {}]   ;;  %s1485_s6 = inlined_call_operand.vmem [shape: f32[1,128], index: 6, kind: input, shape index: {}]   ;;  %s1486_s7 = inlined_call_operand.vmem [shape: f32[8,128], index: 7, kind: output, shape index: {0}]   ;;  %s1487_s8 = inlined_call_operand.vmem [shape: f32[8,128], index: 8, kind: output, shape index: {1}]  }
   0x1   :  { %s22_s28 = sshll.u32 %s1321_s27, 4  ;;  %s23_s28 = int_to_ptr.vmem [resolvable:$true] %s22_s28 }
   0x2   :  { %s1307_s29 = scalar_lea.vmem %s23_s28, 8192  ;;  %p1312_p1 = scmp.lt.s32.totalorder %s23_s28, %s23_s28 }
   0x3   :  { %p1308_p0 = scmp.ne.s32.totalorder %s23_s28, %s1307_s29  ;;  %p1313_p2 = scmp.lt.s32.totalorder %s1307_s29, %s1307_s29 }
   0x5   :  { %p1314_p3 = por %p1313_p2, %p1312_p1 }
   0x7   :  { %p1315_p4 = pnand %p1314_p3, %p1308_p0 }
   0x9   :  { %1318 = shalt.err (!%p1315_p4)
}
   0xa   :  { %s1322_s30 = smov 64   ;;  %s1323_s9 = smov 4  }
   0xb   :  { %28 = dma.hbm_to_vmem [thread:$0]  %s1480_s1, 8192, %s23_s28, [#allocation3], %s1322_s30, %s1322_s30, %s1323_s9  }
   0xc   :  { %1319 = dma.done.wait [#allocation3], 8192  }
   0xd   :  { %1320 = vsyncadd [#allocation3], 4294959104  ;;  %v1215_v0 = vld [vmem:[#allocation2 + $0x78] sm:$0xff]   ;;  %v1219_v4 = vld [vmem:[#allocation2 + $0x70] sm:$0xff]   ;;  %vm1325_vm0 = vmmov 0  }
   0xe   :  { %v1216_v1 = vld [vmem:[#allocation2 + $0xf8] sm:$0xff]   ;;  %1064 = vmatprep.subr.bf16.mxu0 %v1215_v0  ;;  %v1220_v5 = vld [vmem:[#allocation2 + $0xf0] sm:$0xff]   ;;  %v1223_v8 = vld [vmem:[#allocation2 + $0x68] sm:$0xff]  }
   0xf   :  { %v1217_v2 = vld [vmem:[#allocation2 + $0x38] sm:$0xff]   ;;  %1086 = vmatprep.subr.bf16.mxu1 %v1216_v1  ;;  %v1221_v6 = vld [vmem:[#allocation2 + $0x30] sm:$0xff]   ;;  %v1224_v9 = vld [vmem:[#allocation2 + $0xe8] sm:$0xff]  }
  0x10   :  { %v1218_v3 = vld [vmem:[#allocation2 + $0xb8] sm:$0xff]   ;;  %1065 = vmatpush3.bf16.msra.mxu0 %v1217_v2  ;;  %v1222_v7 = vld [vmem:[#allocation2 + $0xb0] sm:$0xff]   ;;  %v1225_v10 = vld [vmem:[#allocation2 + $0x28] sm:$0xff]  }
  0x11   :  { %1087 = vmatpush3.bf16.msra.mxu1 %v1218_v3  ;;  %1066 = vmatprep.subr.bf16.mxu0 %v1219_v4  ;;  %v1226_v11 = vld [vmem:[#allocation2 + $0xa8] sm:$0xff]   ;;  %v1227_v12 = vld [vmem:[#allocation2 + $0x60] sm:$0xff]   ;;  %v1231_v16 = vld [vmem:[#allocation2 + $0x58] sm:$0xff]  }
  0x12   :  { %1088 = vmatprep.subr.bf16.mxu1 %v1220_v5  ;;  %v1228_v13 = vld [vmem:[#allocation2 + $0xe0] sm:$0xff]   ;;  %v1232_v17 = vld [vmem:[#allocation2 + $0xd8] sm:$0xff]   ;;  %v1235_v20 = vld [vmem:[#allocation2 + $0x50] sm:$0xff]  }
  0x13   :  { %v1229_v14 = vld [vmem:[#allocation2 + $0x20] sm:$0xff]   ;;  %v1233_v18 = vld [vmem:[#allocation2 + $0x18] sm:$0xff]   ;;  %v1236_v21 = vld [vmem:[#allocation2 + $0xd0] sm:$0xff]  }
  0x14   :  { %1067 = vmatpush3.bf16.msra.mxu0 %v1221_v6  ;;  %v1230_v15 = vld [vmem:[#allocation2 + $0xa0] sm:$0xff]   ;;  %v1234_v19 = vld [vmem:[#allocation2 + $0x98] sm:$0xff]   ;;  %v1237_v22 = vld [vmem:[#allocation2 + $0x10] sm:$0xff]  }
  0x15   :  { %1089 = vmatpush3.bf16.msra.mxu1 %v1222_v7  ;;  %1068 = vmatprep.subr.bf16.mxu0 %v1223_v8  ;;  %v1238_v23 = vld [vmem:[#allocation2 + $0x90] sm:$0xff]   ;;  %v1239_v24 = vld [vmem:[#allocation2 + $0x48] sm:$0xff]   ;;  %v1243_v28 = vld [vmem:[#allocation2 + $0x40] sm:$0xff]  }
  0x16   :  { %1090 = vmatprep.subr.bf16.mxu1 %v1224_v9  ;;  %v1240_v25 = vld [vmem:[#allocation2 + $0xc8] sm:$0xff]   ;;  %v1244_v29 = vld [vmem:[#allocation2 + $0xc0] sm:$0xff]   ;;  %v46_v33 = vld [vmem:[%s1479_s0 + $0x18] sm:$0xff] }
  0x17   :  { %v1241_v26 = vld [vmem:[#allocation2 + $0x8] sm:$0xff]   ;;  %v1245_v30 = vld [vmem:[#allocation2] sm:$0xff]   ;;  %v54_v36 = vpack.c.bf16 %v46_v33, %v46_v33  ;;  %v45_v38 = vld [vmem:[%s1479_s0 + $0x10] sm:$0xff] }
  0x18   :  { %1069 = vmatpush3.bf16.msra.mxu0 %v1225_v10  ;;  %v1242_v27 = vld [vmem:[#allocation2 + $0x88] sm:$0xff]   ;;  %v1246_v31 = vld [vmem:[#allocation2 + $0x80] sm:$0xff]   ;;  %v53_v39 = vpack.c.bf16 %v45_v38, %v45_v38  ;;  %v1247_v40 = vld [vmem:[#allocation2 + $0x178] sm:$0xff]  }
  0x19   :  { %1091 = vmatpush3.bf16.msra.mxu1 %v1226_v11  ;;  %1070 = vmatprep.subr.bf16.mxu0 %v1227_v12  ;;  %v44_v32 = vld [vmem:[%s1479_s0 + $0x8] sm:$0xff]  ;;  %v43_v34 = vld [vmem:[%s1479_s0] sm:$0xff]  ;;  %v1248_v41 = vld [vmem:[#allocation2 + $0x1f8] sm:$0xff]  }
  0x1a   :  { %1092 = vmatprep.subr.bf16.mxu1 %v1228_v13  ;;  %v52_v35 = vpack.c.bf16 %v44_v32, %v44_v32  ;;  %v51_v37 = vpack.c.bf16 %v43_v34, %v43_v34  ;;  %650 = vmatprep.mubr.bf16.mxu1 %v54_v36  ;;  %v1249_v42 = vld [vmem:[#allocation2 + $0x138] sm:$0xff]   ;;  %v1251_v44 = vld [vmem:[#allocation2 + $0x170] sm:$0xff]   ;;  %v1255_v48 = vld [vmem:[#allocation2 + $0x168] sm:$0xff]  }
  0x1b   :  { %v1250_v43 = vld [vmem:[#allocation2 + $0x1b8] sm:$0xff]   ;;  %v1252_v45 = vld [vmem:[#allocation2 + $0x1f0] sm:$0xff]   ;;  %v1256_v49 = vld [vmem:[#allocation2 + $0x1e8] sm:$0xff]  }
  0x1c   :  { %1071 = vmatpush3.bf16.msra.mxu0 %v1229_v14  ;;  %610 = vmatprep.mubr.bf16.mxu0 %v52_v35  ;;  %v1253_v46 = vld [vmem:[#allocation2 + $0x130] sm:$0xff]   ;;  %v1257_v50 = vld [vmem:[#allocation2 + $0x128] sm:$0xff]   ;;  %v1259_v52 = vld [vmem:[#allocation2 + $0x160] sm:$0xff]  }
  0x1d   :  { %1093 = vmatpush3.bf16.msra.mxu1 %v1230_v15  ;;  %1072 = vmatprep.subr.bf16.mxu0 %v1231_v16  ;;  %v1254_v47 = vld [vmem:[#allocation2 + $0x1b0] sm:$0xff]   ;;  %v1258_v51 = vld [vmem:[#allocation2 + $0x1a8] sm:$0xff]   ;;  %v1260_v53 = vld [vmem:[#allocation2 + $0x1e0] sm:$0xff]   ;;  %v1324_v16 = vmov 0.0  }
  0x1e   :  { %1094 = vmatprep.subr.bf16.mxu1 %v1232_v17  ;;  %v1261_v54 = vld [vmem:[#allocation2 + $0x120] sm:$0xff]   ;;  %v1263_v56 = vld [vmem:[#allocation2 + $0x158] sm:$0xff]   ;;  %v1267_v60 = vld [vmem:[#allocation2 + $0x150] sm:$0xff]  }
  0x1f   :  { %v1262_v55 = vld [vmem:[#allocation2 + $0x1a0] sm:$0xff]   ;;  %v1264_v57 = vld [vmem:[#allocation2 + $0x1d8] sm:$0xff]   ;;  %v1268_v61 = vld [vmem:[#allocation2 + $0x1d0] sm:$0xff]  }
  0x20   :  { %1073 = vmatpush3.bf16.msra.mxu0 %v1233_v18  ;;  %v1265_v58 = vld [vmem:[#allocation2 + $0x118] sm:$0xff]   ;;  %v1269_v62 = vld [vmem:[#allocation2 + $0x110] sm:$0xff]   ;;  %v1271_v0 = vld [vmem:[#allocation2 + $0x148] sm:$0xff]  }
  0x21   :  { %1095 = vmatpush3.bf16.msra.mxu1 %v1234_v19  ;;  %1074 = vmatprep.subr.bf16.mxu0 %v1235_v20  ;;  %v1266_v59 = vld [vmem:[#allocation2 + $0x198] sm:$0xff]   ;;  %v1270_v63 = vld [vmem:[#allocation2 + $0x190] sm:$0xff]   ;;  %v1272_v1 = vld [vmem:[#allocation2 + $0x1c8] sm:$0xff]  }
  0x22   :  { %1096 = vmatprep.subr.bf16.mxu1 %v1236_v21  ;;  %v1273_v2 = vld [vmem:[#allocation2 + $0x108] sm:$0xff]   ;;  %v1275_v4 = vld [vmem:[#allocation2 + $0x140] sm:$0xff]   ;;  %v50_v9 = vld [vmem:[%s1479_s0 + $0x38] sm:$0xff] }
  0x23   :  { %v1274_v3 = vld [vmem:[#allocation2 + $0x188] sm:$0xff]   ;;  %v1276_v5 = vld [vmem:[#allocation2 + $0x1c0] sm:$0xff]   ;;  %v58_v11 = vpack.c.bf16 %v50_v9, %v50_v9  ;;  %v49_v13 = vld [vmem:[%s1479_s0 + $0x30] sm:$0xff] }
  0x24   :  { %1075 = vmatpush3.bf16.msra.mxu0 %v1237_v22  ;;  %v1277_v6 = vld [vmem:[#allocation2 + $0x100] sm:$0xff]   ;;  %v48_v8 = vld [vmem:[%s1479_s0 + $0x28] sm:$0xff]  ;;  %v57_v15 = vpack.c.bf16 %v49_v13, %v49_v13  ;;  %v1279_v17 = vld [vmem:[%s1482_s3 + $0x38] sm:$0xff]  }
  0x25   :  { %1097 = vmatpush3.bf16.msra.mxu1 %v1238_v23  ;;  %1076 = vmatprep.subr.bf16.mxu0 %v1239_v24  ;;  %v1278_v7 = vld [vmem:[#allocation2 + $0x180] sm:$0xff]   ;;  %v56_v10 = vpack.c.bf16 %v48_v8, %v48_v8  ;;  %v1280_v18 = vld [vmem:[%s1482_s3 + $0x30] sm:$0xff]   ;;  %v1281_v19 = vld [vmem:[%s1482_s3 + $0x28] sm:$0xff]  }
  0x26   :  { %1098 = vmatprep.subr.bf16.mxu1 %v1240_v25  ;;  %v47_v12 = vld [vmem:[%s1479_s0 + $0x20] sm:$0xff]  ;;  %v1283_v21 = vld [vmem:[%s1482_s3 + $0x18] sm:$0xff]   ;;  %v1284_v22 = vld [vmem:[%s1482_s3 + $0x10] sm:$0xff]  }
  0x27   :  { %v55_v14 = vpack.c.bf16 %v47_v12, %v47_v12  ;;  %v1282_v20 = vld [vmem:[%s1482_s3 + $0x20] sm:$0xff]   ;;  %v1285_v23 = vld [vmem:[%s1482_s3 + $0x8] sm:$0xff]   ;;  %v1287_v25 = vld [vmem:[%s1484_s5 + $0x38] sm:$0xff]  }
  0x28   :  { %1077 = vmatpush3.bf16.msra.mxu0 %v1241_v26  ;;  %v1286_v24 = vld [vmem:[%s1482_s3] sm:$0xff]   ;;  %v1288_v26 = vld [vmem:[%s1484_s5 + $0x30] sm:$0xff]  }
  0x29   :  { %1099 = vmatpush3.bf16.msra.mxu1 %v1242_v27  ;;  %1078 = vmatprep.subr.bf16.mxu0 %v1243_v28  ;;  %v981_v36 = vld [vmem:[%s1481_s2] ss:$0 sm:$0xff] }
  0x2a   :  { %1100 = vmatprep.subr.bf16.mxu1 %v1244_v29 }
  0x2c   :  { %1079 = vmatpush3.bf16.msra.mxu0 %v1245_v30 }
  0x2d   :  { %1101 = vmatpush3.bf16.msra.mxu1 %v1246_v31  ;;  %1108 = vmatprep.subr.bf16.mxu0 %v1247_v40 }
  0x2e   :  { %1130 = vmatprep.subr.bf16.mxu1 %v1248_v41 }
  0x2f   :  { %611 = vmatmul.mubr.bf16.vlgmr.msra.gmra.mxu0 %v51_v37 }
  0x30   :  { %651 = vmatmul.mubr.bf16.vlgmr.msra.gmra.mxu1 %v53_v39  ;;  %1109 = vmatpush3.bf16.msra.mxu0 %v1249_v42 }
  0x31   :  { %1131 = vmatpush3.bf16.msra.mxu1 %v1250_v43  ;;  %1110 = vmatprep.subr.bf16.mxu0 %v1251_v44 }
  0x32   :  { %1132 = vmatprep.subr.bf16.mxu1 %v1252_v45  ;;  %690 = vmatprep.mubr.bf16.mxu0 %v56_v10  ;;  %v1055_v10 = vld [vmem:[%s1485_s6] ss:$0 sm:$0xff] }
  0x33   :  { %730 = vmatprep.mubr.bf16.mxu1 %v58_v11 }
  0x34   :  { %1111 = vmatpush3.bf16.msra.mxu0 %v1253_v46 }
  0x35   :  { %1133 = vmatpush3.bf16.msra.mxu1 %v1254_v47  ;;  %1112 = vmatprep.subr.bf16.mxu0 %v1255_v48 }
  0x36   :  { %1134 = vmatprep.subr.bf16.mxu1 %v1256_v49 }
  0x38   :  { %1113 = vmatpush3.bf16.msra.mxu0 %v1257_v50 }
  0x39   :  { %1135 = vmatpush3.bf16.msra.mxu1 %v1258_v51  ;;  %1114 = vmatprep.subr.bf16.mxu0 %v1259_v52 }
  0x3a   :  { %1136 = vmatprep.subr.bf16.mxu1 %v1260_v53 }
  0x3c   :  { %1115 = vmatpush3.bf16.msra.mxu0 %v1261_v54 }
  0x3d   :  { %1137 = vmatpush3.bf16.msra.mxu1 %v1262_v55  ;;  %1116 = vmatprep.subr.bf16.mxu0 %v1263_v56 }
  0x3e   :  { %1138 = vmatprep.subr.bf16.mxu1 %v1264_v57  ;;  %v1289_v57 = vld [vmem:[%s1484_s5 + $0x28] sm:$0xff]  }
  0x40   :  { %1117 = vmatpush3.bf16.msra.mxu0 %v1265_v58  ;;  %v1290_v58 = vld [vmem:[%s1484_s5 + $0x20] sm:$0xff]  }
  0x41   :  { %1139 = vmatpush3.bf16.msra.mxu1 %v1266_v59  ;;  %1118 = vmatprep.subr.bf16.mxu0 %v1267_v60  ;;  %v1291_v59 = vld [vmem:[%s1484_s5 + $0x18] sm:$0xff]   ;;  %v1292_v60 = vld [vmem:[%s1484_s5 + $0x10] sm:$0xff]  }
  0x42   :  { %1140 = vmatprep.subr.bf16.mxu1 %v1268_v61  ;;  %v1293_v61 = vld [vmem:[%s1484_s5 + $0x8] sm:$0xff]  }
  0x44   :  { %1119 = vmatpush3.bf16.msra.mxu0 %v1269_v62  ;;  %v1294_v62 = vld [vmem:[%s1484_s5] sm:$0xff]  }
  0x45   :  { %1141 = vmatpush3.bf16.msra.mxu1 %v1270_v63  ;;  %1120 = vmatprep.subr.bf16.mxu0 %v1271_v0  ;;  %v1046_v63 = vld [vmem:[%s1483_s4] ss:$0 sm:$0xff] }
  0x46   :  { %1142 = vmatprep.subr.bf16.mxu1 %v1272_v1 }
  0x48   :  { %1121 = vmatpush3.bf16.msra.mxu0 %v1273_v2 }
  0x49   :  { %1143 = vmatpush3.bf16.msra.mxu1 %v1274_v3  ;;  %1122 = vmatprep.subr.bf16.mxu0 %v1275_v4 }
  0x4a   :  { %1144 = vmatprep.subr.bf16.mxu1 %v1276_v5 }
  0x4c   :  { %1123 = vmatpush3.bf16.msra.mxu0 %v1277_v6 }
  0x4d   :  { %1145 = vmatpush3.bf16.msra.mxu1 %v1278_v7  ;;  %1170 = vmatprep.subr.bf16.mxu0 %v1324_v16 }
  0x4e   :  { %1190 = vmatprep.subr.bf16.mxu1 %v1324_v16 }
  0x4f   :  { %691 = vmatmul.mubr.bf16.vlgmr.msra.gmra.mxu0 %v55_v14 }
  0x50   :  { %731 = vmatmul.mubr.bf16.vlgmr.msra.gmra.mxu1 %v57_v15  ;;  %1171 = vmatpush3.bf16.msra.mxu0 %v1279_v17 }
  0x51   :  { %1172 = vmatprep.subr.bf16.mxu0 %v1324_v16  ;;  %1186 = vmatprep.mubr.msk.bf16.mxu0 %vm1325_vm0, %v1324_v16 }
  0x52   :  { %1206 = vmatprep.mubr.msk.bf16.mxu1 %vm1325_vm0, %v1324_v16  ;;  %1191 = vmatpush3.bf16.msra.mxu1 %v1287_v25 }
  0x53   :  { %1192 = vmatprep.subr.bf16.mxu1 %v1324_v16 }
  0x54   :  { %1173 = vmatpush3.bf16.msra.mxu0 %v1280_v18 }
  0x55   :  { %1174 = vmatprep.subr.bf16.mxu0 %v1324_v16 }
  0x56   :  { %1193 = vmatpush3.bf16.msra.mxu1 %v1288_v26 }
  0x57   :  { %1194 = vmatprep.subr.bf16.mxu1 %v1324_v16 }
  0x58   :  { %1175 = vmatpush3.bf16.msra.mxu0 %v1281_v19 }
  0x59   :  { %1176 = vmatprep.subr.bf16.mxu0 %v1324_v16 }
  0x5a   :  { %1195 = vmatpush3.bf16.msra.mxu1 %v1289_v57 }
  0x5b   :  { %1196 = vmatprep.subr.bf16.mxu1 %v1324_v16 }
  0x5c   :  { %1177 = vmatpush3.bf16.msra.mxu0 %v1282_v20 }
  0x5d   :  { %1178 = vmatprep.subr.bf16.mxu0 %v1324_v16 }
  0x5e   :  { %1197 = vmatpush3.bf16.msra.mxu1 %v1290_v58 }
  0x5f   :  { %1198 = vmatprep.subr.bf16.mxu1 %v1324_v16 }
  0x60   :  { %1179 = vmatpush3.bf16.msra.mxu0 %v1283_v21 }
  0x61   :  { %1180 = vmatprep.subr.bf16.mxu0 %v1324_v16 }
  0x62   :  { %1199 = vmatpush3.bf16.msra.mxu1 %v1291_v59 }
  0x63   :  { %1200 = vmatprep.subr.bf16.mxu1 %v1324_v16 }
  0x64   :  { %1181 = vmatpush3.bf16.msra.mxu0 %v1284_v22 }
  0x65   :  { %1182 = vmatprep.subr.bf16.mxu0 %v1324_v16 }
  0x66   :  { %1201 = vmatpush3.bf16.msra.mxu1 %v1292_v60 }
  0x67   :  { %1202 = vmatprep.subr.bf16.mxu1 %v1324_v16 }
  0x68   :  { %1183 = vmatpush3.bf16.msra.mxu0 %v1285_v23 }
  0x69   :  { %1184 = vmatprep.subr.bf16.mxu0 %v1324_v16 }
  0x6a   :  { %1203 = vmatpush3.bf16.msra.mxu1 %v1293_v61 }
  0x6b   :  { %1204 = vmatprep.subr.bf16.mxu1 %v1324_v16 }
  0x6c   :  { %1185 = vmatpush3.bf16.msra.mxu0 %v1286_v24 }
  0x6e   :  { %1205 = vmatpush3.bf16.msra.mxu1 %v1294_v62 }
  0xef   :  { %v1080_v27 = vpop.f32.mrf.mxu0 }
  0xf0   :  { %v1102_v28 = vpop.f32.mrf.mxu1 }
  0xf1   :  { %v1081_v29 = vpop.f32.mrf.mxu0 }
  0xf2   :  { %v1103_v30 = vpop.f32.mrf.mxu1  ;;  %v1082_v35 = vadd.f32 %v1081_v29, %v1080_v27 }
  0xf3   :  { %v1083_v31 = vpop.f32.mrf.mxu0  ;;  %v1104_v38 = vadd.f32 %v1103_v30, %v1102_v28 }
  0xf4   :  { %v1105_v32 = vpop.f32.mrf.mxu1  ;;  %v613_v37 = vadd.f32 %v1082_v35, %v981_v36 }
  0xf5   :  { %v1084_v33 = vpop.f32.mrf.mxu0 }
  0xf6   :  { %v1106_v34 = vpop.f32.mrf.mxu1  ;;  %v653_v42 = vadd.f32 %v1104_v38, %v613_v37 }
 0x10f   :  { %v1124_v39 = vpop.f32.mrf.mxu0 }
 0x110   :  { %v1146_v40 = vpop.f32.mrf.mxu1 }
 0x111   :  { %v1125_v41 = vpop.f32.mrf.mxu0 }
 0x112   :  { %v1126_v43 = vadd.f32 %v1125_v41, %v1124_v39  ;;  %v1147_v44 = vpop.f32.mrf.mxu1 }
 0x113   :  { %v1127_v45 = vpop.f32.mrf.mxu0  ;;  %v1148_v47 = vadd.f32 %v1147_v44, %v1146_v40 }
 0x114   :  { %v693_v46 = vadd.f32 %v1126_v43, %v653_v42  ;;  %v1149_v48 = vpop.f32.mrf.mxu1 }
 0x115   :  { %v1128_v49 = vpop.f32.mrf.mxu0 }
 0x116   :  { %v733_v50 = vadd.f32 %v1148_v47, %v693_v46  ;;  %v1150_v51 = vpop.f32.mrf.mxu1 }
 0x118   :  { %v738_v52 = vmul.f32 0.5, %v733_v50 }
 0x11a   :  { %1295 = vtanh.f32 %v738_v52 }
 0x127   :  { %v1296_v53 = vpop.eup %1295 }
 0x128   :  { %v740_v54 = vmul.f32 0.5, %v1296_v53 }
 0x12a   :  { %v741_v55 = vadd.f32 0.5, %v740_v54 }
 0x12c   :  { %v742_v56 = vpack.c.bf16 %v741_v55, %v741_v55 }
 0x12e   :  { %1187 = vmatmul.mubr.bf16.vlgmr.msra.gmra.mxu0 %v742_v56 }
 0x1ee   :  { %v848_v0 = vpop.f32.mrf.mxu0 }
 0x1ef   :  { %v849_v1 = vadd.f32 %v1046_v63, %v848_v0 }
 0x1f0   :  { %v1188_v2 = vpop.f32.mrf.mxu0 }
 0x1f1   :  { %v854_v3 = vmul.f32 0.5, %v849_v1 }
 0x1f2   :  { %v851_v4 = vpop.f32.mrf.mxu0 }
 0x1f3   :  { %1297 = vtanh.f32 %v854_v3 }
 0x1f4   :  { %v1189_v5 = vpop.f32.mrf.mxu0 }
 0x200   :  { %v1298_v6 = vpop.eup %1297 }
 0x201   :  { %v856_v7 = vmul.f32 0.5, %v1298_v6 }
 0x203   :  { %v857_v8 = vadd.f32 0.5, %v856_v7 }
 0x205   :  { %858 = vst [vmem:[%s1487_s8] sm:$0xff] %v857_v8  ;;  %v859_v9 = vpack.c.bf16 %v857_v8, %v857_v8 }
 0x207   :  { %1207 = vmatmul.mubr.bf16.vlgmr.msra.gmra.mxu1 %v859_v9 }
 0x2c7   :  { %v965_v11 = vpop.f32.mrf.mxu1 }
 0x2c8   :  { %v966_v12 = vadd.f32 %v1055_v10, %v965_v11 }
 0x2c9   :  { %v1208_v13 = vpop.f32.mrf.mxu1 }
 0x2ca   :  { %971 = vst [vmem:[%s1486_s7] sm:$0xff] %v966_v12 }
 0x2cb   :  { %v968_v14 = vpop.f32.mrf.mxu1 }
 0x2cd   :  { %v1209_v15 = vpop.f32.mrf.mxu1 }
 0x2ce   :  { %980 = vsyncpa [#allocation3], 1 }

</bundles_post_ra>
